<compile_context>
chip_gen: v6e
topology: v6e:2x2x1
jax: 0.10.0
libtpu: 0.0.40
codegen_flags: <defaults>
</compile_context>

<pallas_src>
import itertools

import numpy as np
import jax
import jax.numpy as jnp
from jax.experimental import pallas as pl
from jax.experimental.pallas import tpu as pltpu

ALPHA = 0.8   # SparseInstMatcher(alpha=0.8)
BETA = 0.2    # SparseInstMatcher(beta=0.2)


def _round_up(x, m):
    return ((x + m - 1) // m) * m


def _matcher_kernel(pred_ref, tgtT_ref, tgtsq_ref, prob_ref, c_ref,
                    num_acc, sigsq_acc):
    """Row-tile of queries x all (padded) GT instances, reduced over pixel tiles.

    pred_ref  : (TM, TL)  bf16  raw mask logits tile (padded pixels = -1e4)
    tgtT_ref  : (TL, TP)  bf16  GT masks, pre-transposed (padded cols = 0)
    tgtsq_ref : (1,  TP)  f32   sum(tgt*tgt, -1), precomputed in wrapper
    prob_ref  : (TM, TP)  f32   sigmoid(class logits) gathered at tgt_ids
    c_ref     : (TM, TP)  f32   output cost tile (finalized on last K step)
    num_acc   : (TM, TP)  f32   VMEM scratch: running matmul(sig, tgt^T)
    sigsq_acc : (TM, 1)   f32   VMEM scratch: running sum(sig*sig, -1)
    """
    k = pl.program_id(1)
    nk = pl.num_programs(1)

    @pl.when(k == 0)
    def _():
        num_acc[...] = jnp.zeros_like(num_acc)
        sigsq_acc[...] = jnp.zeros_like(sigsq_acc)

    # Sigmoid in f32 on the EUP; padded pixels (-1e4) -> sigmoid == 0 exactly,
    # so they contribute nothing to either accumulator.
    sig = jax.nn.sigmoid(pred_ref[...].astype(jnp.float32))          # (TM, TL)
    # Dice numerator on the MXU in bf16 with f32 accumulation; GT already
    # transposed so no in-kernel XLU transpose is needed.
    num_acc[...] += jnp.dot(sig.astype(jnp.bfloat16), tgtT_ref[...],
                            preferred_element_type=jnp.float32)
    # Row-sum of sig^2 goes to the XLU (separate slot from VPU/MXU -> cheap).
    sigsq_acc[...] += jnp.sum(sig * sig, axis=-1, keepdims=True)

    @pl.when(k == nk - 1)
    def _():
        denom = sigsq_acc[...] + tgtsq_ref[...] + 1e-4                # (TM, TP)
        # Dice score is >= 0 (sigmoid * nonneg masks); clamp is a cheap guard so
        # the fused exp/log pow below never sees a negative operand.
        score = jnp.maximum(2.0 * num_acc[...] / denom, 0.0)
        prob = prob_ref[...]
        # score**a * prob**b  ==  exp(a*log(score) + b*log(prob))  for x >= 0;
        # log(0) = -inf -> exp(-inf) = 0, matching pow(0, a).  Zero-padded
        # rows/cols therefore yield 0 and are sliced off in the wrapper.
        # Single fused exp -> one EUP op instead of two pow calls.
        c_ref[...] = jnp.exp(ALPHA * jnp.log(score) + BETA * jnp.log(prob))


def compute_cost_matrix(pred_masks, pred_logits, tgt_masks, tgt_ids,
                        *, tm_target=512, tl_target=4096):
    """Returns C of shape (B, N, T), float32 (the matrix fed to Hungarian)."""
    B, N, H, W = pred_masks.shape
    M, L = B * N, H * W
    T = tgt_masks.shape[0]

    # ---- tile-size derivation --------------------------------------------
    # Big row tiles amortize the per-grid-step pipeline overhead, but keep >= 2
    # "parallel" row tiles so both v7x TensorCores get work.
    n_row = max(2, pl.cdiv(M, tm_target))
    tm = _round_up(pl.cdiv(M, n_row), 8)
    Mp = tm * n_row
    # Reduction tiles over pixels bound VMEM independently of mask resolution.
    n_k = max(1, pl.cdiv(L, tl_target))
    tl = _round_up(pl.cdiv(L, n_k), 128)
    Lp = tl * n_k
    # Lane-dense GT dimension (unmasked vst on the output).
    Tp = _round_up(T, 128)

    NEG = -1e4  # sigmoid(NEG) == 0 -> padded pixels contribute nothing

    pred2d = pred_masks.reshape(M, L).astype(jnp.float32)
    tgt2d = tgt_masks.reshape(T, L).astype(jnp.float32)
    # matching_prob = pred_logits.sigmoid().view(B*N, -1)[:, tgt_ids]   (gather = glue)
    prob = jax.nn.sigmoid(pred_logits.astype(jnp.float32)).reshape(M, -1)[:, tgt_ids]

    # Hoisted, grid-invariant GT square sums (f32, on the unpadded masks).
    tgtsq = jnp.sum(tgt2d * tgt2d, axis=-1)                            # (T,)

    pred2d = jnp.pad(pred2d, ((0, Mp - M), (0, Lp - L)),
                     constant_values=NEG).astype(jnp.bfloat16)         # (Mp, Lp)
    tgtT = jnp.pad(tgt2d, ((0, Tp - T), (0, Lp - L))).T \
              .astype(jnp.bfloat16)                                    # (Lp, Tp)
    prob = jnp.pad(prob, ((0, Mp - M), (0, Tp - T)))                   # (Mp, Tp)
    tgtsq = jnp.pad(tgtsq, (0, Tp - T)).reshape(1, Tp)                 # (1, Tp)

    # VMEM budget (double-buffered inputs/outputs + scratch) with headroom,
    # kept under v7x's 64 MiB physical VMEM.
    vmem_bytes = (2 * tm * tl * 2          # pred tile (bf16, double-buffered)
                  + 2 * tl * Tp * 2        # GT tile   (bf16, double-buffered)
                  + 4 * tm * Tp * 4        # prob in + C out (f32, double-buffered)
                  + tm * Tp * 4 + tm * 128 * 4   # scratch accumulators
                  + (1 << 20))
    vmem_limit = int(min(max(vmem_bytes, 32 * 1024 * 1024),
                         48 * 1024 * 1024))

    C = pl.pallas_call(
        _matcher_kernel,
        out_shape=jax.ShapeDtypeStruct((Mp, Tp), jnp.float32),
        grid_spec=pltpu.PrefetchScalarGridSpec(
            num_scalar_prefetch=0,
            grid=(Mp // tm, Lp // tl),
            in_specs=[
                pl.BlockSpec((tm, tl), lambda i, k: (i, k)),   # query logits tile
                pl.BlockSpec((tl, Tp), lambda i, k: (k, 0)),   # GT masks (pre-T)
                pl.BlockSpec((1, Tp), lambda i, k: (0, 0)),    # GT square sums
                pl.BlockSpec((tm, Tp), lambda i, k: (i, 0)),   # matching prob tile
            ],
            out_specs=pl.BlockSpec((tm, Tp), lambda i, k: (i, 0)),
            scratch_shapes=[
                pltpu.VMEM((tm, Tp), jnp.float32),             # numerator acc
                pltpu.VMEM((tm, 1), jnp.float32),              # sig^2 row-sum acc
            ],
        ),
        compiler_params=pltpu.CompilerParams(
            dimension_semantics=("parallel", "arbitrary"),
            vmem_limit_bytes=vmem_limit),
    )(pred2d, tgtT, tgtsq, prob)

    return C[:M, :T].reshape(B, N, T)


def _linear_sum_assignment_maximize(c):
    """Exact brute-force assignment (small problems only), maximize total score."""
    # TODO(synk): Hungarian matching (scipy.optimize.linear_sum_assignment) is a
    # sequential host-side algorithm with no clean Pallas equivalent.
    n_rows, n_cols = c.shape
    if n_cols == 0:
        return (np.asarray([], dtype=np.int64), np.asarray([], dtype=np.int64))
    best_rows, best_val = None, -np.inf
    for rows in itertools.permutations(range(n_rows), n_cols):
        val = sum(c[rows[j], j] for j in range(n_cols))
        if val > best_val:
            best_val, best_rows = val, rows
    pairs = sorted(zip(best_rows, range(n_cols)))
    ri = np.asarray([p[0] for p in pairs], dtype=np.int64)
    ci = np.asarray([p[1] for p in pairs], dtype=np.int64)
    return ri, ci


def sparse_inst_matcher_forward(pred_masks, pred_logits, gt_labels_list,
                                gt_masks_list):
    """Mirrors SparseInstMatcher.forward.

    pred_masks  : (B, N, H, W) f32
    pred_logits : (B, N, num_classes) f32
    gt_labels_list[i] : (t_i,) int32 labels of image i
    gt_masks_list[i]  : (t_i, Hg, Wg) f32 GT masks of image i
    Returns list of B (row_ind, col_ind) int64 numpy pairs.
    """
    B, N, H, W = pred_masks.shape
    sizes = [m.shape[0] for m in gt_masks_list]
    T = int(sum(sizes))
    if T == 0:
        empty = np.asarray([], dtype=np.float32)
        return [(empty, empty)] * B

    tgt_ids = jnp.concatenate([jnp.asarray(l, dtype=jnp.int32)
                               for l in gt_labels_list])
    tgt_masks = jnp.concatenate([jnp.asarray(m, dtype=jnp.float32)
                                 for m in gt_masks_list], axis=0)     # (T, Hg, Wg)
    # F.interpolate(..., mode='bilinear', align_corners=False)  (glue, half-pixel)
    tgt_masks = jax.image.resize(tgt_masks, (T, H, W), method='linear')

    C = compute_cost_matrix(pred_masks, pred_logits, tgt_masks, tgt_ids)
    C_np = np.asarray(jax.block_until_ready(C))                       # (B, N, T)

    indices = []
    offset = 0
    for i, s in enumerate(sizes):
        ci = C_np[i, :, offset:offset + s]
        indices.append(_linear_sum_assignment_maximize(ci))
        offset += s
    return indices


if __name__ == "__main__":
    key = jax.random.PRNGKey(0)
    k1, k2, k3, k4, k5, k6 = jax.random.split(key, 6)

    B, N, H, W = 2, 8, 16, 16
    num_classes = 4
    Hg, Wg = 32, 32                      # GT masks at a different resolution
    sizes = [2, 3]                       # instances per image

    pred_masks = jax.random.normal(k1, (B, N, H, W), dtype=jnp.float32)
    pred_logits = jax.random.normal(k2, (B, N, num_classes), dtype=jnp.float32)

    gt_labels_list = [
        jax.random.randint(k3, (sizes[0],), 0, num_classes),
        jax.random.randint(k4, (sizes[1],), 0, num_classes),
    ]
    gt_masks_list = [
        (jax.random.uniform(k5, (sizes[0], Hg, Wg)) > 0.5).astype(jnp.float32),
        (jax.random.uniform(k6, (sizes[1], Hg, Wg)) > 0.5).astype(jnp.float32),
    ]

    indices = sparse_inst_matcher_forward(pred_masks, pred_logits,
                                          gt_labels_list, gt_masks_list)

    # Basic sanity: one (row, col) pair list per batch image, correct lengths.
    assert len(indices) == B
    for (ri, ci), s in zip(indices, sizes):
        assert ri.shape == (s,) and ci.shape == (s,)

    print("KERNEL_OK")
</pallas_src>

<mosaic_0001>
module attributes {stable_mosaic.version = 11 : i64} {
  func.func @_matcher_kernel(%arg0: i32, %arg1: i32, %arg2: memref<8x256xbf16, #tpu.memory_space<vmem>>, %arg3: memref<256x128xbf16, #tpu.memory_space<vmem>>, %arg4: memref<1x128xf32, #tpu.memory_space<vmem>>, %arg5: memref<8x128xf32, #tpu.memory_space<vmem>>, %arg6: memref<8x128xf32, #tpu.memory_space<vmem>>, %arg7: memref<8x128xf32, #tpu.memory_space<vmem>>, %arg8: memref<8x1xf32, #tpu.memory_space<vmem>>) attributes {dimension_semantics = [#tpu.dimension_semantics<parallel>, #tpu.dimension_semantics<arbitrary>], iteration_bounds = array<i64: 2, 1>, scalar_prefetch = 0 : i64, scratch_operands = 2 : i64, tpu.core_type = #tpu.core_type<tc>, window_params = [{transform_indices = @transform_0, window_bounds = array<i64: 8, 256>}, {transform_indices = @transform_1, window_bounds = array<i64: 256, 128>}, {pipeline_mode = #tpu.pipeline_mode<synchronous>, transform_indices = @transform_2, window_bounds = array<i64: 1, 128>}, {transform_indices = @transform_3, window_bounds = array<i64: 8, 128>}, {transform_indices = @transform_4, window_bounds = array<i64: 8, 128>}]} {
    %c0_i32 = arith.constant 0 : i32
    %0 = arith.cmpi eq, %arg1, %c0_i32 : i32
    %1 = arith.extui %0 : i1 to i32
    %c0_i32_0 = arith.constant 0 : i32
    %2 = arith.cmpi ne, %1, %c0_i32_0 : i32
    scf.if %2 {
      %cst_16 = arith.constant 0.000000e+00 : f32
      %25 = vector.broadcast %cst_16 : f32 to vector<8x128xf32>
      %c0_17 = arith.constant 0 : index
      %c0_18 = arith.constant 0 : index
      %26 = vector.load %arg7[%c0_17, %c0_18] : memref<8x128xf32, #tpu.memory_space<vmem>>, vector<8x128xf32>
      tpu.vector_store %arg7[%c0_17, %c0_18], %25 {strides = array<i32>} : memref<8x128xf32, #tpu.memory_space<vmem>>, vector<8x128xf32>,
      %cst_19 = arith.constant 0.000000e+00 : f32
      %27 = vector.broadcast %cst_19 : f32 to vector<8x1xf32>
      %c0_20 = arith.constant 0 : index
      %c0_21 = arith.constant 0 : index
      %28 = vector.load %arg8[%c0_20, %c0_21] : memref<8x1xf32, #tpu.memory_space<vmem>>, vector<8x1xf32>
      tpu.vector_store %arg8[%c0_20, %c0_21], %27 {strides = array<i32>} : memref<8x1xf32, #tpu.memory_space<vmem>>, vector<8x1xf32>,
    } else {
    }
    %c0 = arith.constant 0 : index
    %c0_1 = arith.constant 0 : index
    %3 = vector.load %arg2[%c0, %c0_1] : memref<8x256xbf16, #tpu.memory_space<vmem>>, vector<8x256xbf16>
    %4 = arith.extf %3 : vector<8x256xbf16> to vector<8x256xf32>
    %5 = arith.negf %4 : vector<8x256xf32>
    %6 = math.exp %5 : vector<8x256xf32>
    %cst = arith.constant 1.000000e+00 : f32
    %7 = vector.broadcast %cst : f32 to vector<8x256xf32>
    %8 = arith.addf %7, %6 : vector<8x256xf32>
    %9 = arith.divf %7, %8 : vector<8x256xf32>
    %c0_2 = arith.constant 0 : index
    %c0_3 = arith.constant 0 : index
    %10 = vector.load %arg7[%c0_2, %c0_3] : memref<8x128xf32, #tpu.memory_space<vmem>>, vector<8x128xf32>
    %11 = arith.truncf %9 : vector<8x256xf32> to vector<8x256xbf16>
    %c0_4 = arith.constant 0 : index
    %c0_5 = arith.constant 0 : index
    %12 = vector.load %arg3[%c0_4, %c0_5] : memref<256x128xbf16, #tpu.memory_space<vmem>>, vector<256x128xbf16>
    %cst_6 = arith.constant dense<0.000000e+00> : vector<8x128xf32>
    %13 = tpu.matmul %11, %12, %cst_6 {dimension_numbers = #tpu.dot_dimension_numbers<[1], [0], [0], [1], [0, 0, 1, 1], [], []>} : vector<8x256xbf16>, vector<256x128xbf16>, vector<8x128xf32> -> vector<8x128xf32>
    %14 = arith.addf %10, %13 : vector<8x128xf32>
    %c0_7 = arith.constant 0 : index
    %c0_8 = arith.constant 0 : index
    %15 = vector.load %arg7[%c0_7, %c0_8] : memref<8x128xf32, #tpu.memory_space<vmem>>, vector<8x128xf32>
    tpu.vector_store %arg7[%c0_7, %c0_8], %14 {strides = array<i32>} : memref<8x128xf32, #tpu.memory_space<vmem>>, vector<8x128xf32>,
    %c0_9 = arith.constant 0 : index
    %c0_10 = arith.constant 0 : index
    %16 = vector.load %arg8[%c0_9, %c0_10] : memref<8x1xf32, #tpu.memory_space<vmem>>, vector<8x1xf32>
    %17 = arith.mulf %9, %9 : vector<8x256xf32>
    %cst_11 = arith.constant dense<0.000000e+00> : vector<8xf32>
    %18 = vector.multi_reduction <add>, %17, %cst_11 [1] : vector<8x256xf32> to vector<8xf32>
    %19 = vector.shape_cast %18 : vector<8xf32> to vector<8x1xf32>
    %20 = arith.addf %16, %19 : vector<8x1xf32>
    %c0_12 = arith.constant 0 : index
    %c0_13 = arith.constant 0 : index
    %21 = vector.load %arg8[%c0_12, %c0_13] : memref<8x1xf32, #tpu.memory_space<vmem>>, vector<8x1xf32>
    tpu.vector_store %arg8[%c0_12, %c0_13], %20 {strides = array<i32>} : memref<8x1xf32, #tpu.memory_space<vmem>>, vector<8x1xf32>,
    %c0_i32_14 = arith.constant 0 : i32
    %22 = arith.cmpi eq, %arg1, %c0_i32_14 : i32
    %23 = arith.extui %22 : i1 to i32
    %c0_i32_15 = arith.constant 0 : i32
    %24 = arith.cmpi ne, %23, %c0_i32_15 : i32
    scf.if %24 {
      %c0_16 = arith.constant 0 : index
      %c0_17 = arith.constant 0 : index
      %25 = vector.load %arg8[%c0_16, %c0_17] : memref<8x1xf32, #tpu.memory_space<vmem>>, vector<8x1xf32>
      %c0_18 = arith.constant 0 : index
      %c0_19 = arith.constant 0 : index
      %26 = vector.load %arg4[%c0_18, %c0_19] : memref<1x128xf32, #tpu.memory_space<vmem>>, vector<1x128xf32>
      %27 = vector.broadcast %25 : vector<8x1xf32> to vector<8x128xf32>
      %28 = vector.broadcast %26 : vector<1x128xf32> to vector<8x128xf32>
      %29 = arith.addf %27, %28 : vector<8x128xf32>
      %cst_20 = arith.constant 9.99999974E-5 : f32
      %30 = vector.broadcast %cst_20 : f32 to vector<8x128xf32>
      %31 = arith.addf %29, %30 : vector<8x128xf32>
      %c0_21 = arith.constant 0 : index
      %c0_22 = arith.constant 0 : index
      %32 = vector.load %arg7[%c0_21, %c0_22] : memref<8x128xf32, #tpu.memory_space<vmem>>, vector<8x128xf32>
      %cst_23 = arith.constant 2.000000e+00 : f32
      %33 = vector.broadcast %cst_23 : f32 to vector<8x128xf32>
      %34 = arith.mulf %33, %32 : vector<8x128xf32>
      %35 = arith.divf %34, %31 : vector<8x128xf32>
      %cst_24 = arith.constant 0.000000e+00 : f32
      %36 = vector.broadcast %cst_24 : f32 to vector<8x128xf32>
      %37 = arith.maximumf %35, %36 : vector<8x128xf32>
      %c0_25 = arith.constant 0 : index
      %c0_26 = arith.constant 0 : index
      %38 = vector.load %arg5[%c0_25, %c0_26] : memref<8x128xf32, #tpu.memory_space<vmem>>, vector<8x128xf32>
      %39 = math.log %37 : vector<8x128xf32>
      %cst_27 = arith.constant 8.000000e-01 : f32
      %40 = vector.broadcast %cst_27 : f32 to vector<8x128xf32>
      %41 = arith.mulf %40, %39 : vector<8x128xf32>
      %42 = math.log %38 : vector<8x128xf32>
      %cst_28 = arith.constant 2.000000e-01 : f32
      %43 = vector.broadcast %cst_28 : f32 to vector<8x128xf32>
      %44 = arith.mulf %43, %42 : vector<8x128xf32>
      %45 = arith.addf %41, %44 : vector<8x128xf32>
      %46 = math.exp %45 : vector<8x128xf32>
      %c0_29 = arith.constant 0 : index
      %c0_30 = arith.constant 0 : index
      %47 = vector.load %arg6[%c0_29, %c0_30] : memref<8x128xf32, #tpu.memory_space<vmem>>, vector<8x128xf32>
      tpu.vector_store %arg6[%c0_29, %c0_30], %46 {strides = array<i32>} : memref<8x128xf32, #tpu.memory_space<vmem>>, vector<8x128xf32>,
    } else {
    }
    return
  }
  func.func @transform_0(%arg0: i32, %arg1: i32) -> (i32, i32) {
    %c0_i32 = arith.constant 0 : i32
    return %arg0, %arg1 : i32, i32
  }
  func.func @transform_1(%arg0: i32, %arg1: i32) -> (i32, i32) {
    %c0_i32 = arith.constant 0 : i32
    %c0_i32_0 = arith.constant 0 : i32
    return %arg1, %c0_i32 : i32, i32
  }
  func.func @transform_2(%arg0: i32, %arg1: i32) -> (i32, i32) {
    %c0_i32 = arith.constant 0 : i32
    %c0_i32_0 = arith.constant 0 : i32
    %c0_i32_1 = arith.constant 0 : i32
    return %c0_i32, %c0_i32_0 : i32, i32
  }
  func.func @transform_3(%arg0: i32, %arg1: i32) -> (i32, i32) {
    %c0_i32 = arith.constant 0 : i32
    %c0_i32_0 = arith.constant 0 : i32
    return %arg0, %c0_i32 : i32, i32
  }
  func.func @transform_4(%arg0: i32, %arg1: i32) -> (i32, i32) {
    %c0_i32 = arith.constant 0 : i32
    %c0_i32_0 = arith.constant 0 : i32
    return %arg0, %c0_i32 : i32, i32
  }
}

</mosaic_0001>

<bundles_post_ra>
// kernel: tpu_custom_call.1
= control target key start
LH: loop header
LB: loop body
LE: loop exit
PB: predicated region body
PF: predicated region fallthrough
CT: control target
= control target key end

     0   :  { %9 = vsyncpa [#allocation5], 0  ;;  %s1250_s0 = inlined_call_operand.hbm [shape: bf16[16,256], index: 0, kind: input, shape index: {}]   ;;  %s1251_s1 = inlined_call_operand.hbm [shape: bf16[256,128], index: 1, kind: input, shape index: {}]   ;;  %s1252_s2 = inlined_call_operand.vmem [shape: f32[1,128], index: 2, kind: input, shape index: {}]   ;;  %s1253_s3 = inlined_call_operand.hbm [shape: f32[16,128], index: 3, kind: input, shape index: {}]   ;;  %s1254_s4 = inlined_call_operand.hbm [shape: f32[16,128], index: 4, kind: output, shape index: {}]  }
   0x1   :  { %11 = vsyncpa [#allocation5 + $0x1], 0 }
   0x2   :  { %12 = vsyncpa [#allocation8], 0 }
   0x3   :  { %13 = vsyncpa [#allocation6], 0 }
   0x4   :  { %15 = vsyncpa [#allocation6 + $0x1], 0  ;;  %s1036_s15 = smov 0   ;;  %s1038_s16 = smov 0  }
   0x5   :  { %s1040_s17 = smov 0   ;;  %s1042_s18 = smov 0  }
   0x6   :  { %s1044_s19 = smov 0   ;;  %s1046_s20 = smov 0  }
   0x7 LB: > { %s33_s21 = sadd.s32 1, %s997_s19  ;;  %s42_s22 = sadd.s32 1, %s989_s17  ;;  %s1001_s20 = sphi %s1046_s20, %s21_s20   ;;  %s997_s19 = sphi %s1044_s19, %s1274_s19   ;;  %s993_s18 = sphi %s1042_s18, %s1273_s18   ;;  %s989_s17 = sphi %s1040_s17, %s1272_s17   ;;  %s985_s16 = sphi %s1038_s16, %s1271_s16   ;;  %s981_s15 = sphi %s1036_s15, %s1270_s15  }
   0x8   : > { %p35_p0 = scmp.ge.s32.totalorder %s33_s21, 2  ;;  %p49_p1 = scmp.ne.s32.totalorder %s989_s17, %s985_s16 }
   0x9   : > { %p50_p2 = scmp.eq.s32.totalorder %s1001_s20, 0  ;;  %p742_p5 = scmp.lt.s32.totalorder %s1001_s20, 2 }
   0xa   : > { %s1276_s21 = smov (%p35_p0, %s33_s21), 0  ;;  %s197_s24 = sand.u32 1, %s1001_s20  }
   0xb   : > { %p51_p4 = por %p50_p2, %p49_p1  ;;  %s37_s23 = ssub.s32 %s997_s19, %s1276_s21 }
   0xc   : > { %p40_p6 = scmp.eq.s32.totalorder %s37_s23, 0  ;;  %s199_s25 = sand.u32 1, %s989_s17  }
   0xd   : > { %s693_s26 = sshll.u32 %s997_s19, 7  ;;  %s1086_s28 = sshll.u32 %s199_s25, 3 }
   0xe   : > { %s1084_s27 = scalar_select %p40_p6, %s989_s17, %s42_s22  }
   0xf   : > { %s209_s5 = scalar_lea.hbm %s1250_s0, %s693_s26  ;;  %p1093_p7 = pnand %p742_p5, %p51_p4 }
  0x10   : > { %s201_s7 = scalar_lea.vmem [#allocation4], %s1086_s28  ;;  %s1098_s9 = scalar_lea.sflag [#allocation5], %s197_s24 }
  0x11   : > { %s211_s8 = sshll.u32 %s201_s7, 4  ;;  %p833_p8 = pneg %p1093_p7  ;;  %s212_s8 = int_to_ptr.vmem [resolvable:$true] %s211_s8 }
  0x12   : > { %s844_s10 = scalar_lea.vmem %s212_s8, 128  ;;  %s1003_s11 = smov [#allocation4]  }
  0x13   : > { %p845_p9 = scmp.ne.s32.totalorder %s212_s8, %s844_s10  ;;  %s849_s12 = sshll.u32 %s1003_s11, 4  ;;  %s850_s12 = int_to_ptr.vmem [resolvable:$false] %s849_s12 }
  0x14   : > { %s851_s13 = scalar_lea.vmem %s850_s12, 256  ;;  %p852_p12 = scmp.lt.s32.totalorder %s212_s8, %s850_s12 }
  0x15   : > { %p847_p10 = pnand %p845_p9, %p833_p8  ;;  %p853_p13 = scmp.lt.s32.totalorder %s851_s13, %s844_s10 }
  0x17   : > { %p848_p11 = pneg %p847_p10  ;;  %p854_p0 = por %p853_p13, %p852_p12 }
  0x19   : > { %p855_p2 = pnand %p854_p0, %p848_p11 }
  0x1b   : > { %858 = shalt.err (!%p855_p2)
}
  0x1c   : > { %733 = dma.hbm_to_vmem [thread:$0]  (!%p1093_p7), %s209_s5, 128, %s212_s8, %s1098_s9  }
  0x1d   : > { %s1109_s14 = sadd.s32 4294967295, %s1001_s20   ;;  %s656_s22 = sadd.s32 4294967294, %s1001_s20  }
  0x1e   : > { %p55_p4 = scmp.ne.s32.totalorder %s985_s16, %s981_s15  ;;  %p1256_p5 = scmp.eq.s32.totalorder %s1109_s14, 0 }
  0x1f   : > { %p152_p6 = scmp.eq.s32.totalorder %s1109_s14, 1  ;;  %p158_p9 = scmp.eq.s32.totalorder %s656_s22, 1 }
  0x20   : > { %p657_p10 = scmp.ge.s32.totalorder %s1001_s20, 1  ;;  %p1119_p11 = por %p1256_p5, %p55_p4 }
  0x21   : > { %p1126_p12 = por %p152_p6, %p49_p1  ;;  %p1130_p13 = por %p158_p9, %p55_p4 }
  0x22   : > { %s1259_s23 = scalar_select %p1119_p11, 1, 0 }
  0x23   : > { %s1260_s24 = scalar_select %p1126_p12, 1, 0 }
  0x24   : > { %s1261_s25 = scalar_select %p1130_p13, 1, 0 }
  0x25   : > { %p165_p0 = scmp.lt.s32.totalorder %s1001_s20, 3  ;;  %s1004_s30 = smov [#allocation7]  }
  0x26   : > { %s180_s5 = sshll.u32 %s1004_s30, 4  ;;  %s227_s10 = scalar_lea.hbm %s1253_s3, %s693_s26  ;;  %s1144_s5 = int_to_ptr.vmem [resolvable:$true] %s180_s5 }
  0x27   : > { %p1135_p2 = pnand %p657_p10, %p165_p0  ;;  %s222_s11 = scalar_lea.vmem [#allocation9], %s1086_s28 }
  0x28   : > { %s229_s12 = sshll.u32 %s222_s11, 4  ;;  %s1005_s30 = smov [#allocation9]   ;;  %s230_s12 = int_to_ptr.vmem [resolvable:$true] %s229_s12 }
  0x29   : > { %p726_p1 = pneg %p1135_p2  ;;  %s872_s22 = scalar_lea.vmem %s230_s12, 128 }
  0x2a   : > { %p873_p6 = scmp.ne.s32.totalorder %s230_s12, %s872_s22  ;;  %s877_s26 = sshll.u32 %s1005_s30, 4  ;;  %s878_s26 = int_to_ptr.vmem [resolvable:$false] %s877_s26 }
  0x2b   : > { %p1151_p4 = pnand %p726_p1, %p1256_p5  ;;  %s879_s7 = scalar_lea.vmem %s878_s26, 256 }
  0x2c   : > { %p875_p9 = pnand %p873_p6, %p833_p8  ;;  %p880_p0 = scmp.lt.s32.totalorder %s230_s12, %s878_s26 }
  0x2d   : > { %p881_p3 = scmp.lt.s32.totalorder %s879_s7, %s872_s22 }
  0x2e   : > { %p876_p10 = pneg %p875_p9 }
  0x2f   : > { %p882_p13 = por %p881_p3, %p880_p0 }
  0x31   : > { %p883_p12 = pnand %p882_p13, %p876_p10 }
  0x33   : > { %886 = shalt.err (!%p883_p12)
}
  0x34   : > { %736 = dma.hbm_to_vmem [thread:$0]  (!%p1093_p7), %s227_s10, 128, %s230_s12, %s1098_s9  }
  0x35   : > { %p889_p8 = pneg %p1151_p4  ;;  %s898_s28 = scalar_lea.vmem %s1144_s5, 2048 }
  0x36   : > { %p899_p1 = scmp.ne.s32.totalorder %s1144_s5, %s898_s28  ;;  %p906_p5 = scmp.lt.s32.totalorder %s1144_s5, %s1144_s5 }
  0x37   : > { %p907_p11 = scmp.lt.s32.totalorder %s898_s28, %s898_s28 }
  0x38   : > { %p901_p6 = pnand %p899_p1, %p889_p8 }
  0x39   : > { %p908_p3 = por %p907_p11, %p906_p5 }
  0x3a   : > { %p902_p9 = pneg %p901_p6 }
  0x3c   : > { %p909_p13 = pnand %p908_p3, %p902_p9 }
  0x3e   : > { %912 = shalt.err (!%p909_p13)
}
  0x3f   : > { %s1006_s8 = smov 64   ;;  %s1007_s6 = smov 4  }
  0x40   : > { %729 = dma.hbm_to_vmem [thread:$0]  (!%p1151_p4), %s1251_s1, 2048, %s1144_s5, [#allocation8], %s1006_s8, %s1006_s8, %s1007_s6  }
  0x41   : > { %238 = sbr.rel (%p1135_p2) target bundleno = 460 (0x1cc), region = 36  ;;  %s240_s9 = sand.u32 (!%p1135_p2), 1, %s1109_s14  }
  0x42   : > { %s242_s10 = sand.u32 (!%p1135_p2), 1, %s985_s16   ;;  %s241_s30 = scalar_lea.sflag (!%p1135_p2), [#allocation5], %s240_s9 }
  0x43   : > { %s1179_s12 = sshll.u32 (!%p1135_p2), %s242_s10, 3  ;;  %p1264_p7 = scmp.ne.s32.totalorder (!%p1135_p2), %s1259_s23, 0 }
  0x44   : > { %s244_s26 = scalar_lea.vmem (!%p1135_p2), [#allocation4], %s1179_s12 }
  0x46   : > { %964 = dma.done.wait (%p1264_p7), %s241_s30, 128  }
  0x47   : > { %966 = vsyncadd (%p1264_p7), %s241_s30, 4294967168  ;;  %p1265_p5 = scmp.eq.s32.totalorder %s1109_s14, 0 }
  0x49   : > { %968 = dma.done.wait (%p1265_p5), [#allocation8], 2048   ;;  %p1266_p11 = pmov %p1265_p5 }
  0x4a   : > { %s257_s29 = scalar_lea.vmem [#allocation9], %s1179_s12 }
  0x4b   : > { %970 = vsyncadd (%p1266_p11), [#allocation8], 4294965248 }
  0x4c   : > { %972 = dma.done.wait (%p1264_p7), %s241_s30, 128  }
  0x4d   : > { %974 = vsyncadd (%p1264_p7), %s241_s30, 4294967168  ;;  %vm295_vm0 = vcmask 7168   ;;  %v1008_v0 = vmov 0.0   ;;  %v297_v1 = vld [vmem:[%s244_s26] sm:$0xff]  ;;  %v803_v10 = vld [vmem:[#allocation7 + $0x68] sm:$0xff]   ;;  %v1009_v33 = vmov 0  }
  0x4e   : > { %296 = vst.msk [vmem:[#allocation3] sm:$0xff] %vm295_vm0, %v1008_v0  ;;  %v298_v2 = vunpack.c.l.bf16 %v297_v1  ;;  %v299_v3 = vunpack.c.h.bf16 %v297_v1  ;;  %v799_v4 = vld [vmem:[#allocation7 + $0x78] sm:$0xff]   ;;  %v801_v8 = vld [vmem:[#allocation7 + $0x70] sm:$0xff]   ;;  %v804_v11 = vld [vmem:[#allocation7 + $0x28] sm:$0xff]   ;;  %798 = vset.pattern.permute.xlu0 %v1009_v33  ;;  %s690_s5 = sshll.u32 %s993_s18, 7  ;;  %s286_s13 = scalar_lea.vmem [#allocation10], %s1179_s12 }
  0x4f   : > { %v800_v5 = vld [vmem:[#allocation7 + $0x38] sm:$0xff]   ;;  %694 = vmatprep.subr.bf16.mxu0 %v799_v4  ;;  %v802_v9 = vld [vmem:[#allocation7 + $0x30] sm:$0xff]   ;;  %v805_v12 = vld [vmem:[#allocation7 + $0x60] sm:$0xff]   ;;  %s542_s7 = sshll.u32 %s286_s13, 4  ;;  %s1207_s6 = scalar_lea.hbm %s1254_s4, %s690_s5  ;;  %s543_s7 = int_to_ptr.vmem [resolvable:$true] %s542_s7 }
  0x50   : > { %v670_v6 = vmul.f32 -1.442695, %v298_v2  ;;  %v671_v7 = vmul.f32 -1.442695, %v299_v3  ;;  %695 = vmatpush3.bf16.msra.mxu0 %v800_v5  ;;  %v806_v13 = vld [vmem:[#allocation7 + $0x20] sm:$0xff]   ;;  %v807_v14 = vld [vmem:[#allocation7 + $0x58] sm:$0xff]  }
  0x51   : > { %696 = vmatprep.subr.bf16.mxu0 %v801_v8  ;;  %v808_v15 = vld [vmem:[#allocation7 + $0x18] sm:$0xff]   ;;  %v809_v16 = vld [vmem:[#allocation7 + $0x50] sm:$0xff]   ;;  %v811_v22 = vld [vmem:[#allocation7 + $0x48] sm:$0xff]   ;;  %s529_s11 = scalar_lea.sflag [#allocation6], %s242_s10  ;;  %s913_s22 = scalar_lea.vmem %s543_s7, 128 }
  0x52   : > { %815 = vpow2.f32 %v670_v6  ;;  %v810_v21 = vld [vmem:[#allocation7 + $0x10] sm:$0xff]   ;;  %v812_v23 = vld [vmem:[#allocation7 + $0x8] sm:$0xff]   ;;  %v813_v24 = vld [vmem:[#allocation7 + $0x40] sm:$0xff]   ;;  %p914_p12 = scmp.ne.s32.totalorder %s543_s7, %s913_s22  ;;  %p1267_p2 = scmp.ne.s32.totalorder %s1260_s24, 0 }
  0x53   : > { %817 = vpow2.f32 %v671_v7  ;;  %v814_v25 = vld [vmem:[#allocation7] sm:$0xff]   ;;  %v688_v43 = vld [vmem:[%s1252_s2] ss:$0 sm:$0xff]  ;;  %s1010_s9 = smov [#allocation10]  }
  0x54   : > { %697 = vmatpush3.bf16.msra.mxu0 %v802_v9  ;;  %v517_v47 = vld [vmem:[%s257_s29] sm:$0xff]  ;;  %p915_p4 = pnand %p914_p12, %p1267_p2  ;;  %s917_s30 = sshll.u32 %s1010_s9, 4  ;;  %s918_s30 = int_to_ptr.vmem [resolvable:$false] %s917_s30 }
  0x55   : > { %698 = vmatprep.subr.bf16.mxu0 %v803_v10  ;;  %v485_v34 = vld [vmem:[#allocation3] sm:$0xff]  ;;  %s919_s18 = scalar_lea.vmem %s918_s30, 256  ;;  %p920_p0 = scmp.lt.s32.totalorder %s543_s7, %s918_s30 }
  0x56   : > { %p916_p10 = pneg %p915_p4  ;;  %p921_p8 = scmp.lt.s32.totalorder %s919_s18, %s913_s22 }
  0x58   : > { %699 = vmatpush3.bf16.msra.mxu0 %v804_v11  ;;  %p922_p1 = por %p921_p8, %p920_p0 }
  0x59   : > { %700 = vmatprep.subr.bf16.mxu0 %v805_v12 }
  0x5a   : > { %p923_p6 = pnand %p922_p1, %p916_p10 }
  0x5c   : > { %701 = vmatpush3.bf16.msra.mxu0 %v806_v13 }
  0x5d   : > { %702 = vmatprep.subr.bf16.mxu0 %v807_v14 }
  0x5f   : > { %v816_v17 = vpop.eup %815 }
  0x60   : > { %v818_v18 = vpop.eup %817  ;;  %v306_v19 = vadd.f32 1.0, %v816_v17  ;;  %703 = vmatpush3.bf16.msra.mxu0 %v808_v15 }
  0x61   : > { %v307_v20 = vadd.f32 1.0, %v818_v18  ;;  %704 = vmatprep.subr.bf16.mxu0 %v809_v16 }
  0x62   : > { %819 = vrcp.f32 %v306_v19 }
  0x63   : > { %821 = vrcp.f32 %v307_v20 }
  0x64   : > { %705 = vmatpush3.bf16.msra.mxu0 %v810_v21 }
  0x65   : > { %706 = vmatprep.subr.bf16.mxu0 %v811_v22 }
  0x68   : > { %707 = vmatpush3.bf16.msra.mxu0 %v812_v23 }
  0x69   : > { %708 = vmatprep.subr.bf16.mxu0 %v813_v24 }
  0x6c   : > { %709 = vmatpush3.bf16.msra.mxu0 %v814_v25 }
  0x6f   : > { %v820_v26 = vpop.eup %819 }
  0x70   : > { %v822_v27 = vpop.eup %821  ;;  %v486_v28 = vmul.f32 %v820_v26, %v820_v26  ;;  %v313_v29 = vpack.c.bf16 %v820_v26, %v820_v26 }
  0x71   : > { %v487_v30 = vmul.f32 %v822_v27, %v822_v27  ;;  %v314_v31 = vpack.c.bf16 %v822_v27, %v822_v27 }
  0x73   : > { %v488_v32 = vadd.f32 %v487_v30, %v486_v28  ;;  %475 = vmatprep.mubr.bf16.mxu0 %v314_v31 }
  0x74   : > { %476 = vmatmul.mubr.bf16.vlgmr.msra.gmra.mxu0 %v313_v29 }
  0x75   : > { %489 = vadd.xlane.f32.xlu0 %v488_v32 }
  0xfe   : > { %v490_v35 = vpop.xlane.xlu0 %489 }
  0xff   : > { %v491_v36 = vadd.f32 %v490_v35, %v485_v34 }
 0x101   : > { %493 = vst.msk [vmem:[#allocation3] sm:$0xff] %vm295_vm0, %v491_v36 }
 0x108   : > { %v497_v37 = vld [vmem:[#allocation3] sm:$0xff] }
 0x109   : > { %501 = vperm.xlu0 %798, %v497_v37  }
 0x134   : > { %v710_v38 = vpop.f32.mrf.mxu0 }
 0x136   : > { %v711_v39 = vpop.f32.mrf.mxu0 }
 0x137   : > { %v712_v40 = vadd.f32 %v711_v39, %v710_v38 }
 0x138   : > { %v713_v41 = vpop.f32.mrf.mxu0 }
 0x139   : > { %v513_v48 = vmul.f32 2.0, %v712_v40 }
 0x13a   : > { %v714_v42 = vpop.f32.mrf.mxu0 }
 0x184   : > { %v502_v44 = vpop.permute.xlu0 %501 }
 0x185   : > { %v510_v45 = vadd.f32 %v688_v43, %v502_v44 }
 0x187   : > { %v511_v46 = vadd.f32 0.0001, %v510_v45 }
 0x189   : > { %823 = vrcp.f32 %v511_v46 }
 0x18a   : > { %825 = vlog2.f32 %v517_v47 }
 0x196   : > { %v824_v49 = vpop.eup %823 }
 0x197   : > { %v515_v50 = vmul.f32 %v824_v49, %v513_v48  ;;  %v826_v52 = vpop.eup %825 }
 0x198   : > { %v522_v53 = vmul.f32 0.6931472, %v826_v52 }
 0x199   : > { %v516_v51 = vmax.f32 %v515_v50, 0.0 }
 0x19a   : > { %v523_v56 = vmul.f32 0.2, %v522_v53 }
 0x19b   : > { %827 = vlog2.f32 %v516_v51 }
 0x1a8   : > { %v828_v54 = vpop.eup %827 }
 0x1a9   : > { %v519_v55 = vmul.f32 0.6931472, %v828_v54 }
 0x1ab   : > { %v520_v57 = vmul.f32 0.8, %v519_v55 }
 0x1ad   : > { %v524_v58 = vadd.f32 %v523_v56, %v520_v57 }
 0x1af   : > { %v525_v59 = vmul.f32 1.442695, %v524_v58 }
 0x1b1   : > { %829 = vpow2.f32 %v525_v59 }
 0x1be   : > { %v830_v60 = vpop.eup %829 }
 0x1bf   : > { %527 = vst [vmem:[%s286_s13] sm:$0xff] %v830_v60 }
 0x1c0   : > { %926 = shalt.err (!%p923_p6)
}
 0x1c1   : > { %s927_s12 = scalar_lea.hbm %s1207_s6, 128  ;;  %s931_s29 = scalar_lea.hbm %s1254_s4, 256 }
 0x1c2   : > { %p928_p9 = scmp.ne.s32.totalorder %s1207_s6, %s927_s12  ;;  %p932_p7 = scmp.lt.s32.totalorder %s1207_s6, %s1254_s4 }
 0x1c3   : > { %p933_p5 = scmp.lt.s32.totalorder %s931_s29, %s927_s12 }
 0x1c4   : > { %p929_p3 = pnand %p928_p9, %p1267_p2 }
 0x1c5   : > { %p934_p11 = por %p933_p5, %p932_p7 }
 0x1c6   : > { %p930_p13 = pneg %p929_p3 }
 0x1c8   : > { %p935_p12 = pnand %p934_p11, %p930_p13 }
 0x1ca   : > { %938 = shalt.err (!%p935_p12)
}
 0x1cb   : > { %724 = dma.vmem_to_hbm [thread:$0]  (%p1267_p2), %s543_s7, 128, %s1207_s6, %s529_s11  }
 0x1cc PF: > { %s554_s5 = sand.u32 1, %s981_s15   ;;  %p1268_p4 = scmp.ne.s32.totalorder %s1261_s25, 0 }
 0x1cd   : > { %p1269_p10 = scmp.ge.s32.totalorder %s1001_s20, 2  ;;  %s555_s13 = scalar_lea.sflag [#allocation6], %s554_s5 }
 0x1cf   : > { %p738_p0 = pnand %p1269_p10, %p1268_p4 }
 0x1d1   : > { %p739_p8 = pneg %p738_p0 }
 0x1d3   : > { %976 = dma.done.wait (%p739_p8), %s555_s13, 128  }
 0x1d4   : > { %978 = vsyncadd (%p739_p8), %s555_s13, 4294967168  ;;  %s21_s20 = sadd.s32 1, %s1001_s20   ;;  %s1270_s15 = smov %s985_s16 }
 0x1d5   : > { %p18_p1 = scmp.ge.s32.totalorder %s21_s20, 4   ;;  %s1271_s16 = smov %s989_s17 }
 0x1d6   : > { %s1272_s17 = smov %s1084_s27  ;;  %s1273_s18 = smov %s997_s19 }
 0x1d7   : > { %s1274_s19 = smov %s1276_s21  ;;  %20 = sbr.rel (!%p18_p1) target bundleno = 7 (0x7), region = 105 }
 0x1dc   :  { %560 = vsyncpa [#allocation5], 1 }
 0x1dd   :  { %562 = vsyncpa [#allocation5 + $0x1], 1 }
 0x1de   :  { %563 = vsyncpa [#allocation8], 1 }
 0x1df   :  { %564 = vsyncpa [#allocation6], 1 }
 0x1e0   :  { %566 = vsyncpa [#allocation6 + $0x1], 1 }

</bundles_post_ra>
